<compile_context>
chip_gen: v7x
topology: tpu7x:2x2x1
jax: 0.10.0
libtpu: 0.0.40
codegen_flags: <defaults>
</compile_context>

<pallas_src>
import math

import jax
import jax.numpy as jnp
from jax.experimental import pallas as pl
from jax.experimental.pallas import tpu as pltpu


def _pick_seq_tile(seq_len: int, max_tile: int = 256) -> int:
    """Largest multiple of 8 that divides seq_len and is <= max_tile.

    Falls back to the full seq_len when it is not a multiple of 8 (a full-extent
    block is always legal w.r.t. the (8, 128) constraint)."""
    if seq_len % 8 != 0:
        return seq_len
    best = 8
    t = 8
    while t <= min(max_tile, seq_len):
        if seq_len % t == 0:
            best = t
        t += 8
    return best


def _make_kernel(seq_len: int, tile_s: int, vocab: int, emb_dim: int):
    scale = math.sqrt(float(emb_dim))

    def kernel(ids_ref, emb_hbm, pe_ref, out_ref, gather_buf, sem):
        # ids_ref   : SMEM (B*S,) int32          (scalar-prefetched token ids, flattened b-major)
        # emb_hbm   : HBM  (V, D) f32            (embedding table, never staged wholesale in VMEM)
        # pe_ref    : VMEM (tile_s, D) f32       (PE tile for this sequence block; reused over b)
        # out_ref   : VMEM (tile_s, D) f32       (output tile)
        # gather_buf: VMEM (2, tile_s, D) f32    (double-buffered gathered rows)
        # sem       : DMA semaphores (2,)        (one shared semaphore per buffer slot)
        s = pl.program_id(0)        # sequence-block index (outer, parallel)
        b = pl.program_id(1)        # batch index (inner, arbitrary/sequential)
        nb = pl.num_programs(1)
        slot = b % 2

        def issue_gather(batch_idx, slot_idx):
            base = batch_idx * seq_len + s * tile_s

            @pl.loop(0, tile_s)
            def _(r):
                tok = ids_ref[base + r]
                tok = jnp.minimum(jnp.maximum(tok, 0), vocab - 1)  # bounds-safe gather
                pltpu.make_async_copy(
                    emb_hbm.at[tok], gather_buf.at[slot_idx, r], sem.at[slot_idx]
                ).start()

        # Prime: first inner step of every sequence block gathers its own tile.
        @pl.when(b == 0)
        def _():
            issue_gather(0, 0)

        # Prefetch the NEXT batch tile into the other slot BEFORE waiting on the current one,
        # so its gather overlaps this step's wait/compute/writeback.  (SMEM id reads happen
        # here, before any .wait(), to keep sst->sld forwarding intact.)
        @pl.when(b + 1 < nb)
        def _():
            issue_gather(b + 1, (b + 1) % 2)

        # Wait for all row DMAs of the current slot (all signal the same per-slot semaphore).
        @pl.loop(0, tile_s)
        def _(r):
            pltpu.make_async_copy(
                emb_hbm.at[0], gather_buf.at[slot, r], sem.at[slot]
            ).wait()

        # Single lane-dense full-tile scale + PE add + store (unmasked vst when D % 128 == 0).
        out_ref[...] = gather_buf[slot] * scale + pe_ref[...]

    return kernel


def output_emb_forward(ids, emb_table, pe_table, *, max_seq_tile=256):
    """ids: (B, S) int32; emb_table: (V, D) f32; pe_table: (S, D) f32 -> (B, S, D) f32."""
    B, S = ids.shape
    V, D = emb_table.shape
    assert pe_table.shape == (S, D)
    # D should be a multiple of 128 for unmasked lane-dense stores (correct otherwise, just slower).

    tile_s = _pick_seq_tile(S, max_seq_tile)
    s_blocks = S // tile_s

    kernel = _make_kernel(S, tile_s, V, D)

    # Real footprint: 2x gather slots + 2x PE double-buffer + 2x out double-buffer, plus headroom.
    # Cap at 48 MiB so we never ask for all of v7x's 64 MiB per-TC VMEM.
    tile_bytes = tile_s * D * 4
    vmem_limit = int(min(8 * tile_bytes + (4 << 20), 48 << 20))

    # TODO(synk): the flattened (B*S,) scalar-prefetch id array lives in SMEM; for very large
    # B*S (>= ~256K tokens) switch to per-tile SMEM id delivery instead of whole-array prefetch.
    out_flat = pl.pallas_call(
        kernel,
        out_shape=jax.ShapeDtypeStruct((B * S, D), jnp.float32),
        grid_spec=pltpu.PrefetchScalarGridSpec(
            num_scalar_prefetch=1,  # flattened ids -> SMEM
            grid=(s_blocks, B),     # sequence outer -> PE tile reused across inner batch axis
            in_specs=[
                pl.BlockSpec(memory_space=pl.ANY),                     # emb table stays in HBM
                pl.BlockSpec((tile_s, D), lambda s, b, ids: (s, 0)),   # PE tile (constant over b)
            ],
            out_specs=pl.BlockSpec(
                (tile_s, D), lambda s, b, ids: (b * s_blocks + s, 0)
            ),
            scratch_shapes=[
                pltpu.VMEM((2, tile_s, D), jnp.float32),  # double-buffered gathered rows
                pltpu.SemaphoreType.DMA((2,)),            # one shared sem per buffer slot
            ],
        ),
        compiler_params=pltpu.CompilerParams(
            # Outer (sequence) axis is megacore-parallel on v7x; inner (batch) axis must be
            # sequential because the cross-step gather prefetch relies on its iteration order.
            dimension_semantics=("parallel", "arbitrary"),
            vmem_limit_bytes=vmem_limit,
        ),
    )(ids.reshape(-1).astype(jnp.int32), emb_table, pe_table)

    return out_flat.reshape(B, S, D)


def make_positional_encoding(seq_len, emb_dim):
    """Standard sinusoidal positional encoding (S, D)."""
    pos = jnp.arange(seq_len, dtype=jnp.float32)[:, None]
    div = jnp.exp(
        jnp.arange(0, emb_dim, 2, dtype=jnp.float32) * (-math.log(10000.0) / emb_dim)
    )
    pe = jnp.zeros((seq_len, emb_dim), dtype=jnp.float32)
    pe = pe.at[:, 0::2].set(jnp.sin(pos * div))
    pe = pe.at[:, 1::2].set(jnp.cos(pos * div))
    return pe


if __name__ == "__main__":
    # Small, deterministic setup consistent with OutputEmb(input_dim, emb_dim, ...).
    B, S = 2, 512        # batch, sequence length
    V, D = 96, 128       # input_dim (vocab), emb_dim
    pad_idx = 0

    key = jax.random.PRNGKey(0)
    k_emb, k_ids = jax.random.split(key)

    # Deterministic "parameters": nn.Embedding weight with padding_idx row zeroed.
    emb_table = jax.random.normal(k_emb, (V, D), dtype=jnp.float32)
    emb_table = emb_table.at[pad_idx].set(0.0)

    pe_table = make_positional_encoding(S, D)

    ids = jax.random.randint(k_ids, (B, S), 0, V, dtype=jnp.int32)

    # TODO(synk): nn.Dropout is treated as identity (eval mode); training-mode RNG dropout not implemented.
    out = output_emb_forward(ids, emb_table, pe_table)
    out = jax.block_until_ready(out)

    # Pure-JAX reference check of the forward semantics.
    ref = emb_table[ids] * math.sqrt(float(D)) + pe_table[None, :, :]
    assert out.shape == (B, S, D)
    assert jnp.allclose(out, ref, atol=1e-5, rtol=1e-5)

    print("KERNEL_OK")
</pallas_src>

<mosaic_0001>
module attributes {stable_mosaic.version = 11 : i64} {
  func.func @kernel(%arg0: i32, %arg1: i32, %arg2: memref<1024xi32, #tpu.memory_space<smem>>, %arg3: memref<96x128xf32, #tpu.memory_space<any>>, %arg4: memref<256x128xf32, #tpu.memory_space<vmem>>, %arg5: memref<256x128xf32, #tpu.memory_space<vmem>>, %arg6: memref<2x256x128xf32, #tpu.memory_space<vmem>>, %arg7: memref<2x!tpu.dma_semaphore, #tpu.memory_space<semaphore_mem>>) attributes {dimension_semantics = [#tpu.dimension_semantics<parallel>, #tpu.dimension_semantics<arbitrary>], iteration_bounds = array<i64: 2, 2>, scalar_prefetch = 1 : i64, scratch_operands = 2 : i64, tpu.core_type = #tpu.core_type<tc>, window_params = [{}, {transform_indices = @transform_1, window_bounds = array<i64: 256, 128>}, {transform_indices = @transform_2, window_bounds = array<i64: 256, 128>}]} {
    %c2_i32 = arith.constant 2 : i32
    %c0_i32 = arith.constant 0 : i32
    %0 = arith.cmpi eq, %c2_i32, %c0_i32 : i32
    %c1_i32 = arith.constant 1 : i32
    %1 = arith.select %0, %c1_i32, %c2_i32 : i32
    %2 = arith.remsi %arg1, %1 : i32
    %c0_i32_0 = arith.constant 0 : i32
    %3 = arith.cmpi ne, %2, %c0_i32_0 : i32
    %c0_i32_1 = arith.constant 0 : i32
    %4 = arith.cmpi slt, %2, %c0_i32_1 : i32
    %c0_i32_2 = arith.constant 0 : i32
    %5 = arith.cmpi slt, %1, %c0_i32_2 : i32
    %6 = arith.xori %4, %5 : i1
    %7 = arith.andi %6, %3 : i1
    %8 = arith.addi %2, %1 : i32
    %9 = arith.select %7, %8, %2 : i32
    %c0_i32_3 = arith.constant 0 : i32
    %10 = arith.cmpi eq, %arg1, %c0_i32_3 : i32
    %11 = arith.extui %10 : i1 to i32
    %c0_i32_4 = arith.constant 0 : i32
    %12 = arith.cmpi ne, %11, %c0_i32_4 : i32
    scf.if %12 {
      %c256_i32_16 = arith.constant 256 : i32
      %26 = arith.muli %arg0, %c256_i32_16 : i32
      %c0_i32_17 = arith.constant 0 : i32
      %27 = arith.addi %c0_i32_17, %26 : i32
      %c0_i32_18 = arith.constant 0 : i32
      %c256_i32_19 = arith.constant 256 : i32
      %28 = arith.addi %c0_i32_18, %c256_i32_19 : i32
      %c1_i32_20 = arith.constant 1 : i32
      scf.for %arg8 = %c0_i32_18 to %28 step %c1_i32_20  : i32 {
        %c1_i32_22 = arith.constant 1 : i32
        %29 = arith.muli %arg8, %c1_i32_22 : i32
        %c0_i32_23 = arith.constant 0 : i32
        %30 = arith.addi %c0_i32_23, %29 : i32
        %31 = arith.addi %27, %30 : i32
        %32 = arith.index_cast %31 : i32 to index
        %33 = memref.load %arg2[%32] : memref<1024xi32, #tpu.memory_space<smem>>
        %c0_i32_24 = arith.constant 0 : i32
        %34 = arith.maxsi %33, %c0_i32_24 : i32
        %c95_i32 = arith.constant 95 : i32
        %35 = arith.minsi %34, %c95_i32 : i32
        %c0_i32_25 = arith.constant 0 : i32
        %c0_i32_26 = arith.constant 0 : i32
        %c0_i32_27 = arith.constant 0 : i32
        %36 = tpu.memref_slice %arg3[%35, %c0_i32_27] : memref<96x128xf32, #tpu.memory_space<any>> -> memref<1x128xf32, #tpu.memory_space<any>>
        %37 = tpu.memref_squeeze %36 : memref<1x128xf32, #tpu.memory_space<any>> -> memref<128xf32, #tpu.memory_space<any>>
        %c0_i32_28 = arith.constant 0 : i32
        %38 = tpu.memref_slice %arg6[%c0_i32_25, %30, %c0_i32_28] : memref<2x256x128xf32, #tpu.memory_space<vmem>> -> memref<1x1x128xf32, #tpu.memory_space<vmem>>
        %39 = tpu.memref_squeeze %38 : memref<1x1x128xf32, #tpu.memory_space<vmem>> -> memref<128xf32, #tpu.memory_space<vmem>>
        %40 = tpu.memref_slice %arg7[%c0_i32_26] : memref<2x!tpu.dma_semaphore, #tpu.memory_space<semaphore_mem>> -> memref<1x!tpu.dma_semaphore, #tpu.memory_space<semaphore_mem>>
        %41 = tpu.memref_squeeze %40 : memref<1x!tpu.dma_semaphore, #tpu.memory_space<semaphore_mem>> -> memref<!tpu.dma_semaphore, #tpu.memory_space<semaphore_mem>>
        tpu.enqueue_dma source(%37 : memref<128xf32, #tpu.memory_space<any>>) target(%39 : memref<128xf32, #tpu.memory_space<vmem>>) target_semaphore(%41 : memref<!tpu.dma_semaphore, #tpu.memory_space<semaphore_mem>>)
      }
      %c256_i32_21 = arith.constant 256 : i32
    } else {
    }
    %c1_i32_5 = arith.constant 1 : i32
    %13 = arith.addi %arg1, %c1_i32_5 : i32
    %c2_i32_6 = arith.constant 2 : i32
    %14 = arith.cmpi slt, %13, %c2_i32_6 : i32
    %15 = arith.extui %14 : i1 to i32
    %c0_i32_7 = arith.constant 0 : i32
    %16 = arith.cmpi ne, %15, %c0_i32_7 : i32
    scf.if %16 {
      %c1_i32_16 = arith.constant 1 : i32
      %26 = arith.addi %arg1, %c1_i32_16 : i32
      %c1_i32_17 = arith.constant 1 : i32
      %27 = arith.addi %arg1, %c1_i32_17 : i32
      %c2_i32_18 = arith.constant 2 : i32
      %c0_i32_19 = arith.constant 0 : i32
      %28 = arith.cmpi eq, %c2_i32_18, %c0_i32_19 : i32
      %c1_i32_20 = arith.constant 1 : i32
      %29 = arith.select %28, %c1_i32_20, %c2_i32_18 : i32
      %30 = arith.remsi %27, %29 : i32
      %c0_i32_21 = arith.constant 0 : i32
      %31 = arith.cmpi ne, %30, %c0_i32_21 : i32
      %c0_i32_22 = arith.constant 0 : i32
      %32 = arith.cmpi slt, %30, %c0_i32_22 : i32
      %c0_i32_23 = arith.constant 0 : i32
      %33 = arith.cmpi slt, %29, %c0_i32_23 : i32
      %34 = arith.xori %32, %33 : i1
      %35 = arith.andi %34, %31 : i1
      %36 = arith.addi %30, %29 : i32
      %37 = arith.select %35, %36, %30 : i32
      %c512_i32 = arith.constant 512 : i32
      %38 = arith.muli %26, %c512_i32 : i32
      %c256_i32_24 = arith.constant 256 : i32
      %39 = arith.muli %arg0, %c256_i32_24 : i32
      %40 = arith.addi %38, %39 : i32
      %c0_i32_25 = arith.constant 0 : i32
      %c256_i32_26 = arith.constant 256 : i32
      %41 = arith.addi %c0_i32_25, %c256_i32_26 : i32
      %c1_i32_27 = arith.constant 1 : i32
      scf.for %arg8 = %c0_i32_25 to %41 step %c1_i32_27  : i32 {
        %c1_i32_29 = arith.constant 1 : i32
        %42 = arith.muli %arg8, %c1_i32_29 : i32
        %c0_i32_30 = arith.constant 0 : i32
        %43 = arith.addi %c0_i32_30, %42 : i32
        %44 = arith.addi %40, %43 : i32
        %45 = arith.index_cast %44 : i32 to index
        %46 = memref.load %arg2[%45] : memref<1024xi32, #tpu.memory_space<smem>>
        %c0_i32_31 = arith.constant 0 : i32
        %47 = arith.maxsi %46, %c0_i32_31 : i32
        %c95_i32 = arith.constant 95 : i32
        %48 = arith.minsi %47, %c95_i32 : i32
        %c0_i32_32 = arith.constant 0 : i32
        %49 = tpu.memref_slice %arg3[%48, %c0_i32_32] : memref<96x128xf32, #tpu.memory_space<any>> -> memref<1x128xf32, #tpu.memory_space<any>>
        %50 = tpu.memref_squeeze %49 : memref<1x128xf32, #tpu.memory_space<any>> -> memref<128xf32, #tpu.memory_space<any>>
        %c0_i32_33 = arith.constant 0 : i32
        %51 = tpu.memref_slice %arg6[%37, %43, %c0_i32_33] : memref<2x256x128xf32, #tpu.memory_space<vmem>> -> memref<1x1x128xf32, #tpu.memory_space<vmem>>
        %52 = tpu.memref_squeeze %51 : memref<1x1x128xf32, #tpu.memory_space<vmem>> -> memref<128xf32, #tpu.memory_space<vmem>>
        %53 = tpu.memref_slice %arg7[%37] : memref<2x!tpu.dma_semaphore, #tpu.memory_space<semaphore_mem>> -> memref<1x!tpu.dma_semaphore, #tpu.memory_space<semaphore_mem>>
        %54 = tpu.memref_squeeze %53 : memref<1x!tpu.dma_semaphore, #tpu.memory_space<semaphore_mem>> -> memref<!tpu.dma_semaphore, #tpu.memory_space<semaphore_mem>>
        tpu.enqueue_dma source(%50 : memref<128xf32, #tpu.memory_space<any>>) target(%52 : memref<128xf32, #tpu.memory_space<vmem>>) target_semaphore(%54 : memref<!tpu.dma_semaphore, #tpu.memory_space<semaphore_mem>>)
      }
      %c256_i32_28 = arith.constant 256 : i32
    } else {
    }
    %c0_i32_8 = arith.constant 0 : i32
    %c256_i32 = arith.constant 256 : i32
    %17 = arith.addi %c0_i32_8, %c256_i32 : i32
    %c1_i32_9 = arith.constant 1 : i32
    scf.for %arg8 = %c0_i32_8 to %17 step %c1_i32_9  : i32 {
      %c1_i32_16 = arith.constant 1 : i32
      %26 = arith.muli %arg8, %c1_i32_16 : i32
      %c0_i32_17 = arith.constant 0 : i32
      %27 = arith.addi %c0_i32_17, %26 : i32
      %c0_i32_18 = arith.constant 0 : i32
      %c0_i32_19 = arith.constant 0 : i32
      %28 = tpu.memref_slice %arg3[%c0_i32_18, %c0_i32_19] : memref<96x128xf32, #tpu.memory_space<any>> -> memref<1x128xf32, #tpu.memory_space<any>>
      %29 = tpu.memref_squeeze %28 : memref<1x128xf32, #tpu.memory_space<any>> -> memref<128xf32, #tpu.memory_space<any>>
      %c0_i32_20 = arith.constant 0 : i32
      %30 = tpu.memref_slice %arg6[%9, %27, %c0_i32_20] : memref<2x256x128xf32, #tpu.memory_space<vmem>> -> memref<1x1x128xf32, #tpu.memory_space<vmem>>
      %31 = tpu.memref_squeeze %30 : memref<1x1x128xf32, #tpu.memory_space<vmem>> -> memref<128xf32, #tpu.memory_space<vmem>>
      %32 = tpu.memref_slice %arg7[%9] : memref<2x!tpu.dma_semaphore, #tpu.memory_space<semaphore_mem>> -> memref<1x!tpu.dma_semaphore, #tpu.memory_space<semaphore_mem>>
      %33 = tpu.memref_squeeze %32 : memref<1x!tpu.dma_semaphore, #tpu.memory_space<semaphore_mem>> -> memref<!tpu.dma_semaphore, #tpu.memory_space<semaphore_mem>>
      tpu.wait_dma2 semaphore(%33 : memref<!tpu.dma_semaphore, #tpu.memory_space<semaphore_mem>>) src(%29 : memref<128xf32, #tpu.memory_space<any>>) dst(%31 : memref<128xf32, #tpu.memory_space<vmem>>)
    }
    %c256_i32_10 = arith.constant 256 : i32
    %18 = arith.index_cast %9 : i32 to index
    %c0 = arith.constant 0 : index
    %c0_11 = arith.constant 0 : index
    %19 = vector.load %arg6[%18, %c0, %c0_11] : memref<2x256x128xf32, #tpu.memory_space<vmem>>, vector<1x256x128xf32>
    %20 = vector.shape_cast %19 : vector<1x256x128xf32> to vector<256x128xf32>
    %cst = arith.constant 11.3137083 : f32
    %21 = vector.broadcast %cst : f32 to vector<256x128xf32>
    %22 = arith.mulf %20, %21 : vector<256x128xf32>
    %c0_12 = arith.constant 0 : index
    %c0_13 = arith.constant 0 : index
    %23 = vector.load %arg4[%c0_12, %c0_13] : memref<256x128xf32, #tpu.memory_space<vmem>>, vector<256x128xf32>
    %24 = arith.addf %22, %23 : vector<256x128xf32>
    %c0_14 = arith.constant 0 : index
    %c0_15 = arith.constant 0 : index
    %25 = vector.load %arg5[%c0_14, %c0_15] : memref<256x128xf32, #tpu.memory_space<vmem>>, vector<256x128xf32>
    tpu.vector_store %arg5[%c0_14, %c0_15], %24 {strides = array<i32>} : memref<256x128xf32, #tpu.memory_space<vmem>>, vector<256x128xf32>,
    return
  }
  func.func @transform_1(%arg0: i32, %arg1: i32, %arg2: memref<1024xi32, #tpu.memory_space<smem>>) -> (i32, i32) {
    %c0_i32 = arith.constant 0 : i32
    %c0_i32_0 = arith.constant 0 : i32
    return %arg0, %c0_i32 : i32, i32
  }
  func.func @transform_2(%arg0: i32, %arg1: i32, %arg2: memref<1024xi32, #tpu.memory_space<smem>>) -> (i32, i32) {
    %c2_i32 = arith.constant 2 : i32
    %0 = arith.muli %arg1, %c2_i32 : i32
    %1 = arith.addi %0, %arg0 : i32
    %c0_i32 = arith.constant 0 : i32
    %c0_i32_0 = arith.constant 0 : i32
    return %1, %c0_i32 : i32, i32
  }
}

</mosaic_0001>

<bundles_post_ra>
// kernel: tpu_custom_call.1
= control target key start
LH: loop header
LB: loop body
LE: loop exit
PB: predicated region body
PF: predicated region fallthrough
CT: control target
= control target key end

     0   :  { %s1424_s0 = inlined_call_operand.hbm [shape: s32[1024], index: 0, kind: input, shape index: {}]   ;;  %s1425_s1 = inlined_call_operand.hbm [shape: f32[96,128], index: 1, kind: input, shape index: {}]   ;;  %s1426_s2 = inlined_call_operand.hbm [shape: f32[512,128], index: 2, kind: input, shape index: {}]   ;;  %s1427_s3 = inlined_call_operand.hbm [shape: f32[1024,128], index: 3, kind: output, shape index: {}]  }
   0x1   :  { %1436 = sst [smem:[#allocation28_spill]] %s1426_s2  ;;  %s750_s14 = scalar_lea.hbm %s1424_s0, 128 }
   0x2   :  { %p751_p0 = scmp.ne.s32.totalorder %s1424_s0, %s750_s14  ;;  %p754_p1 = scmp.lt.u32.totalorder %s750_s14, %s1424_s0 }
   0x4   :  { %p756_p2 = pnand %p754_p1, %p751_p0 }
   0x6   :  { %759 = shalt.err (!%p756_p2)  }
   0x7   :  { %s990_s19 = smov [#allocation5]  }
   0x8   :  { %9 = dma.hbm_to_smem %s1424_s0, 128, %s990_s19, [#allocation4] }
   0x9   :  { %922 = dma.done.wait [#allocation4], 128 }
   0xa   :  { %923 = vsyncadd [#allocation4], 4294967168 }
   0xb   :  { %11 = sfence }
   0xc   :  { %12 = vsyncpa [#allocation7], 0 }
   0xd   :  { %14 = vsyncpa [#allocation7 + $0x1], 0 }
   0xe   :  { %15 = vsyncpa [#allocation8], 0 }
   0xf   :  { %17 = vsyncpa [#allocation8 + $0x1], 0  ;;  %s1031_s22 = smov 0   ;;  %s1033_s23 = smov 0  }
  0x10   :  { %s1035_s24 = smov 0   ;;  %s1037_s25 = smov 0  }
  0x11   :  { %s1039_s26 = smov 0   ;;  %s1041_s27 = smov 0  }
  0x12   :  { %s1043_s0 = smov 0   ;;  %s1045_s28 = smov 0  }
  0x13   :  { %s1047_s29 = smov 0   ;;  %s1049_s30 = smov 0  }
  0x14   :  { %s1051_s4 = smov 0  }
  0x15 LB: > { %1437 = sst [smem:[#allocation20_spill]] %s952_s26  ;;  %s566_s5 = sadd.s32 4294967295, %s976_s4   ;;  %s976_s4 = sphi %s1051_s4, %s23_s4   ;;  %s972_s30 = sphi %s1049_s30, %s1462_s30   ;;  %s968_s29 = sphi %s1047_s29, %s1461_s29   ;;  %s964_s28 = sphi %s1045_s28, %s1460_s28   ;;  %s960_s0 = sphi %s1043_s0, %s1459_s0   ;;  %s956_s27 = sphi %s1041_s27, %s1458_s27   ;;  %s952_s26 = sphi %s1039_s26, %s1457_s26   ;;  %s948_s25 = sphi %s1037_s25, %s1456_s25   ;;  %s944_s24 = sphi %s1035_s24, %s1465_s24   ;;  %s940_s23 = sphi %s1033_s23, %s1464_s23   ;;  %s936_s22 = sphi %s1031_s22, %s1463_s22  }
  0x16   : > { %1438 = sst [smem:[#allocation21_spill]] %s956_s27  ;;  %s567_s6 = sadd.s32 4294967294, %s976_s4  }
  0x17   : > { %1439 = sst [smem:[#allocation22_spill]] %s968_s29  ;;  %s32_s7 = sadd.s32 1, %s968_s29 }
  0x18   : > { %1440 = sst [smem:[#allocation23_spill]] %s972_s30  ;;  %s35_s8 = sadd.s32 1, %s972_s30 }
  0x19   : > { %p33_p3 = scmp.ge.s32.totalorder %s32_s7, 2  ;;  %s42_s9 = sadd.s32 1, %s956_s27 }
  0x1a   : > { %p49_p4 = scmp.ne.s32.totalorder %s956_s27, %s952_s26  ;;  %p50_p5 = scmp.eq.s32.totalorder %s976_s4, 0 }
  0x1b   : > { %s1467_s7 = smov (%p33_p3, %s32_s7), 0  ;;  %s1469_s8 = smov (!%p33_p3, %s35_s8), %s972_s30 }
  0x1c   : > { %1441 = sst [smem:[#allocation24_spill]] %s1467_s7  ;;  %p1095_p6 = por %p50_p5, %p49_p4 }
  0x1d   : > { %p55_p7 = scmp.ne.s32.totalorder %s952_s26, %s948_s25  ;;  %p37_p8 = scmp.ge.s32.totalorder %s1469_s8, 2 }
  0x1e   : > { %p56_p9 = scmp.eq.s32.totalorder %s566_s5, 0  ;;  %s568_s11 = sshll.u32 %s968_s29, 1 }
  0x1f   : > { %s569_s12 = sshll.u32 %s1467_s7, 1  ;;  %s1471_s8 = smov (%p37_p8, %s1469_s8), 0 }
  0x20   : > { %1443 = sst [smem:[#allocation25_spill]] %s1471_s8  ;;  %p1104_p10 = por %p56_p9, %p55_p7 }
  0x21   : > { %s66_s14 = sadd.s32 %s972_s30, %s568_s11  ;;  %s39_s15 = ssub.s32 %s972_s30, %s1471_s8 }
  0x22   : > { %s68_s16 = sadd.s32 %s569_s12, %s1471_s8  ;;  %p40_p11 = scmp.eq.s32.totalorder %s39_s15, 0 }
  0x23   : > { %s69_s17 = ssub.s32 %s66_s14, %s68_s16  ;;  %s72_s18 = sadd.s32 1, %s944_s24 }
  0x24   : > { %p70_p12 = scmp.eq.s32.totalorder %s69_s17, 0  ;;  %p82_p13 = scmp.ne.s32.totalorder %s944_s24, %s940_s23 }
  0x25   : > { %s1114_s19 = scalar_select %p40_p11, %s956_s27, %s42_s9  }
  0x26   : > { %s1117_s20 = scalar_select %p70_p12, %s944_s24, %s72_s18  }
  0x27   : > { %1445 = sst [smem:[#allocation26_spill]] %s1114_s19  ;;  %p83_p0 = scmp.eq.s32.totalorder %s566_s5, 3 }
  0x28   : > { %p88_p1 = scmp.ne.s32.totalorder %s940_s23, %s936_s22  ;;  %p89_p2 = scmp.eq.s32.totalorder %s567_s6, 3 }
  0x29   : > { %p1125_p3 = por %p83_p0, %p82_p13  ;;  %p631_p5 = scmp.lt.s32.totalorder %s976_s4, 4 }
  0x2a   : > { %p1129_p4 = por %p89_p2, %p88_p1  ;;  %s109_s11 = sand.u32 1, %s956_s27  }
  0x2b   : > { %s1446_s21 = scalar_select %p1125_p3, 1, 0 }
  0x2c   : > { %s1447_s25 = scalar_select %p1129_p4, 1, 0 }
  0x2d   : > { %s611_s12 = sshll.u32 %s972_s30, 12  ;;  %s572_s9 = sshll.u32 %s109_s11, 8 }
  0x2e   : > { %s1448_s2 = sld [smem:[#allocation28_spill]]  ;;  %s113_s5 = scalar_lea.vmem [#allocation6], %s572_s9 }
  0x2f   : > { %s120_s6 = sshll.u32 %s113_s5, 4  ;;  %p1143_p7 = pnand %p631_p5, %p1095_p6  ;;  %s1147_s6 = int_to_ptr.vmem [resolvable:$true] %s120_s6 }
  0x30   : > { %s1149_s18 = scalar_lea.sflag [#allocation7], %s109_s11 }
  0x31   : > { %p762_p9 = pneg %p1143_p7 }
  0x34   : > { %s1139_s16 = scalar_lea.hbm %s1448_s2, %s611_s12  ;;  %s765_s9 = scalar_lea.hbm %s1448_s2, 8192 }
  0x35   : > { %s760_s14 = scalar_lea.hbm %s1139_s16, 4096  ;;  %p766_p6 = scmp.lt.u32.totalorder %s1139_s16, %s1448_s2 }
  0x36   : > { %p761_p8 = scmp.ne.s32.totalorder %s1139_s16, %s760_s14  ;;  %p767_p13 = scmp.lt.u32.totalorder %s765_s9, %s760_s14 }
  0x37   : > { %p769_p1 = scmp.lt.u32.totalorder %s760_s14, %s1139_s16 }
  0x38   : > { %p763_p11 = pnand %p762_p9, %p761_p8  ;;  %p768_p0 = por %p767_p13, %p766_p6 }
  0x3a   : > { %p764_p12 = pneg %p763_p11  ;;  %p770_p2 = por %p769_p1, %p768_p0 }
  0x3c   : > { %p771_p5 = pnand %p770_p2, %p764_p12 }
  0x3e   : > { %774 = shalt.err (!%p771_p5)
}
  0x3f   : > { %s775_s11 = scalar_lea.vmem %s1147_s6, 4096  ;;  %s991_s12 = smov [#allocation6]  }
  0x40   : > { %p776_p8 = scmp.ne.s32.totalorder %s1147_s6, %s775_s11  ;;  %s780_s10 = sshll.u32 %s991_s12, 4  ;;  %s781_s10 = int_to_ptr.vmem [resolvable:$false] %s780_s10 }
  0x41   : > { %s782_s15 = scalar_lea.vmem %s781_s10, 8192  ;;  %p783_p3 = scmp.lt.s32.totalorder %s1147_s6, %s781_s10 }
  0x42   : > { %p778_p11 = pnand %p776_p8, %p762_p9  ;;  %p784_p6 = scmp.lt.s32.totalorder %s782_s15, %s775_s11 }
  0x44   : > { %p779_p4 = pneg %p778_p11  ;;  %p785_p13 = por %p784_p6, %p783_p3 }
  0x46   : > { %p786_p0 = pnand %p785_p13, %p779_p4 }
  0x48   : > { %789 = shalt.err (!%p786_p0)
}
  0x49   : > { %s992_s14 = smov 128   ;;  %s993_s9 = smov 8  }
  0x4a   : > { %626 = dma.hbm_to_vmem [thread:$0]  (!%p1143_p7), %s1139_s16, 4096, %s1147_s6, %s1149_s18, %s992_s14, %s992_s14, %s993_s9  }
  0x4b   : > { %p575_p9 = scmp.ge.s32.totalorder %s976_s4, 1  ;;  %p128_p12 = scmp.lt.s32.totalorder %s976_s4, 5 }
  0x4d   : > { %p129_p1 = pnand %p575_p9, %p128_p12 }
  0x4f   : > { %132 = sbr.rel (%p129_p1) target bundleno = 263 (0x107), region = 24 }
  0x56   : > { %s134_s5 = sand.u32 1, %s952_s26  }
  0x57   : > { %s576_s11 = sshll.u32 %s134_s5, 8  ;;  %s135_s12 = scalar_lea.sflag [#allocation7], %s134_s5 }
  0x58   : > { %s1180_s10 = scalar_lea.vmem [#allocation6], %s576_s11 }
  0x59   : > { %925 = dma.done.wait (%p1104_p10), %s135_s12, 4096  }
  0x5a   : > { %927 = vsyncadd (%p1104_p10), %s135_s12, 4294963200  ;;  %s1429_s16 = sand.u32 1, %s940_s23   ;;  %p161_p3 = scmp.lt.s32.totalorder %s960_s0, 0 }
  0x5b   : > { %s577_s6 = sshll.u32 %s1429_s16, 8  ;;  %s162_s17 = ssub.s32 0, %s960_s0 }
  0x5c   : > { %s578_s18 = smin.u32 %s960_s0, %s162_s17  ;;  %s1194_s13 = scalar_lea.vmem [#allocation9], %s577_s6 }
  0x5d   : > { %s164_s15 = sand.u32 1, %s578_s18   ;;  %p581_p10 = scmp.ne.s32.totalorder %s960_s0, 0 }
  0x5e   : > { %s165_s14 = ssub.s32 0, %s164_s15  ;;  %s1198_s11 = smov (!%p581_p10), 0  }
  0x5f   : > { %s1473_s14 = smov (!%p161_p3, %s165_s14), %s164_s15  ;;  %176 = sbr.rel (%p581_p10) target bundleno = 147 (0x93), region = 32 }
  0x60   : > { %p580_p4 = scmp.lt.s32.totalorder %s1473_s14, 0  ;;  %s171_s9 = sadd.s32 2, %s1473_s14 }
  0x62   : > { %s1475_s9 = smov (!%p580_p4, %s171_s9), %s1473_s14 }
  0x66 LB: >> { %s1450_s5 = sshll.u32 %s964_s28, 8  ;;  %s192_s6 = scalar_lea.vmem [#allocation2], %s980_s11  ;;  %s980_s11 = sphi %s1198_s11, %s183_s11  }
  0x67   : >> { %s184_s12 = sadd.s32 %s980_s11, %s1450_s5  ;;  %s200_s18 = sshll.u32 %s192_s6, 4  ;;  %s201_s18 = int_to_ptr.vmem [resolvable:$true] %s200_s18 }
  0x68   : >> { %s185_s17 = sld [smem:[#allocation5 + %s184_s12]]  ;;  %s792_s29 = scalar_lea.hbm %s1425_s1, 1536 }
  0x6e   : >> { %p186_p7 = scmp.gt.s32.totalorder %s185_s17, 0  ;;  %p583_p2 = scmp.lt.s32.totalorder %s185_s17, 95 }
  0x70   : >> { %s1477_s17 = smov (!%p186_p7, %s185_s17), 0 }
  0x71   : >> { %s1479_s17 = smov (!%p583_p2, %s1477_s17), 95 }
  0x72   : >> { %s588_s15 = sshll.u32 %s1479_s17, 4 }
  0x73   : >> { %s191_s2 = scalar_lea.hbm %s1425_s1, %s588_s15 }
  0x74   : >> { %s790_s8 = scalar_lea.hbm %s191_s2, 16  ;;  %p793_p8 = scmp.lt.u32.totalorder %s191_s2, %s1425_s1 }
  0x75   : >> { %p791_p5 = scmp.ne.s32.totalorder %s191_s2, %s790_s8  ;;  %p794_p11 = scmp.lt.u32.totalorder %s792_s29, %s790_s8 }
  0x76   : >> { %p796_p13 = scmp.lt.u32.totalorder %s790_s8, %s191_s2 }
  0x77   : >> { %p795_p6 = por %p794_p11, %p793_p8 }
  0x79   : >> { %p797_p0 = por %p796_p13, %p795_p6 }
  0x7b   : >> { %p798_p9 = pnand %p797_p0, %p791_p5 }
  0x7d   : >> { %801 = shalt.err (!%p798_p9)  }
  0x7e   : >> { %s802_s17 = scalar_lea.vmem %s201_s18, 16  ;;  %s994_s16 = smov [#allocation2]  }
  0x7f   : >> { %p803_p12 = scmp.ne.s32.totalorder %s201_s18, %s802_s17  ;;  %s804_s6 = sshll.u32 %s994_s16, 4  ;;  %s805_s6 = int_to_ptr.vmem [resolvable:$false] %s804_s6 }
  0x80   : >> { %s806_s15 = scalar_lea.vmem %s805_s6, 8192  ;;  %p807_p1 = scmp.lt.s32.totalorder %s201_s18, %s805_s6 }
  0x81   : >> { %p808_p3 = scmp.lt.s32.totalorder %s806_s15, %s802_s17 }
  0x83   : >> { %p809_p4 = por %p808_p3, %p807_p1 }
  0x85   : >> { %p810_p10 = pnand %p809_p4, %p803_p12 }
  0x87   : >> { %813 = shalt.err (!%p810_p10)  }
  0x88   : >> { %203 = dma.hbm_to_vmem [thread:$0]  %s191_s2, 16, %s201_s18, [#allocation3] }
  0x89   : >> { %s183_s11 = sadd.s32 1, %s980_s11  }
  0x8a   : >> { %p180_p7 = scmp.ge.s32.totalorder %s183_s11, 256  }
  0x8c   : > { %182 = sbr.rel (!%p180_p7) target bundleno = 102 (0x66), region = 114 }
  0x93 PF: > { %s204_s29 = sadd.s32 1, %s960_s0 }
  0x94   : > { %p589_p2 = scmp.ge.s32.totalorder %s204_s29, 2 }
  0x95   : > { %p209_p5 = scmp.lt.s32.totalorder (!%p589_p2), %s204_s29, 0  ;;  %s210_s30 = ssub.s32 (!%p589_p2), 0, %s204_s29 }
  0x96   : > { %208 = sbr.rel (%p589_p2) target bundleno = 211 (0xd3), region = 47  ;;  %s590_s7 = smin.u32 (!%p589_p2), %s210_s30, %s204_s29 }
  0x97   : > { %s614_s8 = sshll.u32 (!%p589_p2), %s960_s0, 9  ;;  %s212_s5 = sand.u32 (!%p589_p2), 1, %s590_s7  }
  0x98   : > { %s615_s14 = sadd.s32 (!%p589_p2), 512, %s614_s8  ;;  %s213_s2 = ssub.s32 (!%p589_p2), 0, %s212_s5 }
  0x99   : > { %s594_s18 = sshll.u32 (!%p589_p2), %s964_s28, 8  ;;  %s1226_s17 = smov (!%p589_p2), 0  }
  0x9a   : > { %s1222_s12 = sadd.s32 (!%p589_p2), %s615_s14, %s594_s18 }
  0x9b   : > { %1451 = sst [smem:[#allocation27_spill]] (!%p589_p2), %s1222_s12 }
  0x9d   : > { %s1481_s2 = smov (!%p209_p5, %s213_s2), %s212_s5 }
  0x9e   : > { %p592_p8 = scmp.lt.s32.totalorder %s1481_s2, 0  ;;  %s219_s11 = sadd.s32 2, %s1481_s2 }
  0xa0   : > { %s1483_s11 = smov (!%p592_p8, %s219_s11), %s1481_s2 }
  0xa1 LB: >> { %s1452_s12 = sld [smem:[#allocation27_spill]]  ;;  %s601_s16 = sshll.u32 %s1483_s11, 8  ;;  %s984_s17 = sphi %s1226_s17, %s229_s17  }
  0xa2   : >> { %s239_s29 = sadd.s32 %s984_s17, %s601_s16  ;;  %s241_s18 = scalar_lea.sflag [#allocation3], %s1483_s11 }
  0xa3   : >> { %s240_s30 = scalar_lea.vmem [#allocation2], %s239_s29 }
  0xa4   : >> { %s249_s7 = sshll.u32 %s240_s30, 4  ;;  %s250_s7 = int_to_ptr.vmem [resolvable:$true] %s249_s7 }
  0xa7   : >> { %s230_s6 = sadd.s32 %s984_s17, %s1452_s12 }
  0xa8   : >> { %s231_s15 = sld [smem:[#allocation5 + %s230_s6]]  ;;  %s816_s6 = scalar_lea.hbm %s1425_s1, 1536 }
  0xae   : >> { %p232_p11 = scmp.gt.s32.totalorder %s231_s15, 0  ;;  %p595_p6 = scmp.lt.s32.totalorder %s231_s15, 95 }
  0xb0   : >> { %s1485_s15 = smov (!%p232_p11, %s231_s15), 0 }
  0xb1   : >> { %s1487_s15 = smov (!%p595_p6, %s1485_s15), 95 }
  0xb2   : >> { %s600_s8 = sshll.u32 %s1487_s15, 4 }
  0xb3   : >> { %s237_s2 = scalar_lea.hbm %s1425_s1, %s600_s8 }
  0xb4   : >> { %s814_s19 = scalar_lea.hbm %s237_s2, 16  ;;  %p817_p0 = scmp.lt.u32.totalorder %s237_s2, %s1425_s1 }
  0xb5   : >> { %p815_p13 = scmp.ne.s32.totalorder %s237_s2, %s814_s19  ;;  %p818_p9 = scmp.lt.u32.totalorder %s816_s6, %s814_s19 }
  0xb6   : >> { %p820_p1 = scmp.lt.u32.totalorder %s814_s19, %s237_s2 }
  0xb7   : >> { %p819_p12 = por %p818_p9, %p817_p0 }
  0xb9   : >> { %p821_p3 = por %p820_p1, %p819_p12 }
  0xbb   : >> { %p822_p4 = pnand %p821_p3, %p815_p13 }
  0xbd   : >> { %825 = shalt.err (!%p822_p4)  }
  0xbe   : >> { %s826_s15 = scalar_lea.vmem %s250_s7, 16  ;;  %s995_s29 = smov [#allocation2]  }
  0xbf   : >> { %p827_p10 = scmp.ne.s32.totalorder %s250_s7, %s826_s15  ;;  %s828_s30 = sshll.u32 %s995_s29, 4  ;;  %s829_s30 = int_to_ptr.vmem [resolvable:$false] %s828_s30 }
  0xc0   : >> { %s830_s8 = scalar_lea.vmem %s829_s30, 8192  ;;  %p831_p7 = scmp.lt.s32.totalorder %s250_s7, %s829_s30 }
  0xc1   : >> { %p832_p2 = scmp.lt.s32.totalorder %s830_s8, %s826_s15 }
  0xc3   : >> { %p833_p5 = por %p832_p2, %p831_p7 }
  0xc5   : >> { %p834_p8 = pnand %p833_p5, %p827_p10 }
  0xc7   : >> { %837 = shalt.err (!%p834_p8)  }
  0xc8   : >> { %252 = dma.hbm_to_vmem [thread:$0]  %s237_s2, 16, %s250_s7, %s241_s18 }
  0xc9   : >> { %s229_s17 = sadd.s32 1, %s984_s17  }
  0xca   : >> { %p226_p11 = scmp.ge.s32.totalorder %s229_s17, 256  }
  0xcc   : > { %228 = sbr.rel (!%p226_p11) target bundleno = 161 (0xa1), region = 125 }
  0xd3 PF: > { %s986_s26 = smov 0  }
  0xd4 LB: >> { %s259_s27 = scalar_lea.sflag [#allocation3], %s1475_s9  ;;  %s988_s26 = sphi %s986_s26, %s258_s26  }
  0xd5   : >> { %928 = dma.done.wait %s259_s27, 16 }
  0xd6   : >> { %929 = vsyncadd %s259_s27, 4294967280  ;;  %s258_s26 = sadd.s32 1, %s988_s26  }
  0xd7   : >> { %p255_p6 = scmp.ge.s32.totalorder %s258_s26, 256  }
  0xd8   : > { %s602_s19 = sshll.u32 (%p255_p6), %s1475_s9, 8  ;;  %v328_v0 = vld [vmem:[%s1180_s10] sm:$0xff] (%p255_p6)  ;;  %v329_v1 = vld [vmem:[%s1180_s10 + $0x8] sm:$0xff] (%p255_p6)  ;;  %v330_v2 = vld [vmem:[%s1180_s10 + $0x10] sm:$0xff] (%p255_p6)  ;;  %s604_s9 = sshll.u32 (%p255_p6), %s960_s0, 1 }
  0xd9   : > { %257 = sbr.rel (!%p255_p6) target bundleno = 212 (0xd4), region = 136  ;;  %s1253_s12 = scalar_lea.vmem (%p255_p6), [#allocation2], %s602_s19  ;;  %v331_v6 = vld [vmem:[%s1180_s10 + $0x18] sm:$0xff] (%p255_p6)  ;;  %v332_v10 = vld [vmem:[%s1180_s10 + $0x20] sm:$0xff] (%p255_p6)  ;;  %v333_v11 = vld [vmem:[%s1180_s10 + $0x28] sm:$0xff] (%p255_p6) }
  0xda   : > { %v264_v3 = vld [vmem:[%s1253_s12] sm:$0xff] (%p255_p6)  ;;  %v265_v4 = vld [vmem:[%s1253_s12 + $0x8] sm:$0xff] (%p255_p6)  ;;  %v266_v5 = vld [vmem:[%s1253_s12 + $0x10] sm:$0xff] (%p255_p6)  ;;  %s1327_s0 = sadd.s32 (%p255_p6), %s964_s28, %s604_s9  ;;  %s440_s28 = sshll.u32 (%p255_p6), %s1194_s13, 4  ;;  %s1350_s28 = int_to_ptr.vmem [resolvable:$true] %s440_s28 }
  0xdb   : > { %v296_v7 = vmul.f32 (%p255_p6), 11.313708, %v264_v3  ;;  %v297_v8 = vmul.f32 (%p255_p6), 11.313708, %v265_v4  ;;  %v298_v9 = vmul.f32 (%p255_p6), 11.313708, %v266_v5 }
  0xdc   : > { %v267_v12 = vld [vmem:[%s1253_s12 + $0x18] sm:$0xff] (%p255_p6)  ;;  %v268_v13 = vld [vmem:[%s1253_s12 + $0x20] sm:$0xff] (%p255_p6)  ;;  %v269_v14 = vld [vmem:[%s1253_s12 + $0x28] sm:$0xff] (%p255_p6)  ;;  %s618_s11 = sshll.u32 (%p255_p6), %s1327_s0, 12  ;;  %s1453_s14 = sand.u32 (%p255_p6), 1, %s940_s23  }
  0xdd   : > { %v360_v15 = vadd.f32 (%p255_p6), %v328_v0, %v296_v7  ;;  %v361_v16 = vadd.f32 (%p255_p6), %v329_v1, %v297_v8  ;;  %v362_v17 = vadd.f32 (%p255_p6), %v330_v2, %v298_v9  ;;  %v299_v18 = vmul.f32 (%p255_p6), 11.313708, %v267_v12  ;;  %v270_v19 = vld [vmem:[%s1253_s12 + $0x30] sm:$0xff] (%p255_p6)  ;;  %v271_v21 = vld [vmem:[%s1253_s12 + $0x38] sm:$0xff] (%p255_p6)  ;;  %v272_v28 = vld [vmem:[%s1253_s12 + $0x40] sm:$0xff] (%p255_p6)  ;;  %s1356_s5 = scalar_lea.hbm (%p255_p6), %s1427_s3, %s618_s11  ;;  %s838_s2 = scalar_lea.vmem (%p255_p6), %s1350_s28, 4096 }
  0xde   : > { %v334_v20 = vld [vmem:[%s1180_s10 + $0x30] sm:$0xff] (%p255_p6)  ;;  %v300_v22 = vmul.f32 (%p255_p6), 11.313708, %v268_v13  ;;  %v301_v23 = vmul.f32 (%p255_p6), 11.313708, %v269_v14  ;;  %v335_v27 = vld [vmem:[%s1180_s10 + $0x38] sm:$0xff] (%p255_p6)  ;;  %p839_p13 = scmp.ne.s32.totalorder (%p255_p6), %s1350_s28, %s838_s2 }
  0xdf   : > { %v302_v24 = vmul.f32 (%p255_p6), 11.313708, %v270_v19  ;;  %392 = vst [vmem:[%s1194_s13] sm:$0xff] (%p255_p6), %v360_v15  ;;  %393 = vst [vmem:[%s1194_s13 + $0x8] sm:$0xff] (%p255_p6), %v361_v16  ;;  %v363_v25 = vadd.f32 (%p255_p6), %v331_v6, %v299_v18  ;;  %v303_v26 = vmul.f32 (%p255_p6), 11.313708, %v271_v21  ;;  %v336_v29 = vld [vmem:[%s1180_s10 + $0x40] sm:$0xff] (%p255_p6) }
  0xe0   : > { %394 = vst [vmem:[%s1194_s13 + $0x10] sm:$0xff] %v362_v17  ;;  %v364_v30 = vadd.f32 %v332_v10, %v300_v22  ;;  %v365_v31 = vadd.f32 %v333_v11, %v301_v23  ;;  %v304_v33 = vmul.f32 11.313708, %v272_v28  ;;  %v273_v34 = vld [vmem:[%s1253_s12 + $0x48] sm:$0xff]  ;;  %v274_v36 = vld [vmem:[%s1253_s12 + $0x50] sm:$0xff]  ;;  %v275_v41 = vld [vmem:[%s1253_s12 + $0x58] sm:$0xff] }
  0xe1   : > { %v366_v32 = vadd.f32 %v334_v20, %v302_v24  ;;  %v337_v35 = vld [vmem:[%s1180_s10 + $0x48] sm:$0xff]  ;;  %395 = vst [vmem:[%s1194_s13 + $0x18] sm:$0xff] %v363_v25  ;;  %v367_v37 = vadd.f32 %v335_v27, %v303_v26  ;;  %v305_v38 = vmul.f32 11.313708, %v273_v34  ;;  %v306_v39 = vmul.f32 11.313708, %v274_v36 }
  0xe2   : > { %v338_v40 = vld [vmem:[%s1180_s10 + $0x50] sm:$0xff]  ;;  %396 = vst [vmem:[%s1194_s13 + $0x20] sm:$0xff] %v364_v30  ;;  %397 = vst [vmem:[%s1194_s13 + $0x28] sm:$0xff] %v365_v31  ;;  %v368_v42 = vadd.f32 %v336_v29, %v304_v33  ;;  %v307_v43 = vmul.f32 11.313708, %v275_v41  ;;  %v339_v44 = vld [vmem:[%s1180_s10 + $0x58] sm:$0xff] }
  0xe3   : > { %398 = vst [vmem:[%s1194_s13 + $0x30] sm:$0xff] %v366_v32  ;;  %v276_v45 = vld [vmem:[%s1253_s12 + $0x60] sm:$0xff]  ;;  %399 = vst [vmem:[%s1194_s13 + $0x38] sm:$0xff] %v367_v37  ;;  %v369_v47 = vadd.f32 %v337_v35, %v305_v38  ;;  %v370_v48 = vadd.f32 %v338_v40, %v306_v39  ;;  %v277_v50 = vld [vmem:[%s1253_s12 + $0x68] sm:$0xff]  ;;  %p1454_p0 = scmp.ne.s32.totalorder %s1446_s21, 0  ;;  %s996_s18 = smov [#allocation9]  }
  0xe4   : > { %v340_v46 = vld [vmem:[%s1180_s10 + $0x60] sm:$0xff]  ;;  %v308_v49 = vmul.f32 11.313708, %v276_v45  ;;  %v341_v51 = vld [vmem:[%s1180_s10 + $0x68] sm:$0xff]  ;;  %v278_v52 = vld [vmem:[%s1253_s12 + $0x70] sm:$0xff]  ;;  %400 = vst [vmem:[%s1194_s13 + $0x40] sm:$0xff] %v368_v42  ;;  %v371_v53 = vadd.f32 %v339_v44, %v307_v43 }
  0xe5   : > { %v309_v54 = vmul.f32 11.313708, %v277_v50  ;;  %v310_v55 = vmul.f32 11.313708, %v278_v52  ;;  %v342_v56 = vld [vmem:[%s1180_s10 + $0x70] sm:$0xff]  ;;  %v279_v57 = vld [vmem:[%s1253_s12 + $0x78] sm:$0xff]  ;;  %p840_p9 = pnand %p839_p13, %p1454_p0 }
  0xe6   : > { %401 = vst [vmem:[%s1194_s13 + $0x48] sm:$0xff] %v369_v47  ;;  %402 = vst [vmem:[%s1194_s13 + $0x50] sm:$0xff] %v370_v48  ;;  %v372_v58 = vadd.f32 %v340_v46, %v308_v49  ;;  %v311_v59 = vmul.f32 11.313708, %v279_v57  ;;  %v343_v60 = vld [vmem:[%s1180_s10 + $0x78] sm:$0xff]  ;;  %v280_v61 = vld [vmem:[%s1253_s12 + $0x80] sm:$0xff] }
  0xe7   : > { %v344_v62 = vld [vmem:[%s1180_s10 + $0x80] sm:$0xff]  ;;  %403 = vst [vmem:[%s1194_s13 + $0x58] sm:$0xff] %v371_v53  ;;  %v373_v63 = vadd.f32 %v341_v51, %v309_v54  ;;  %v374_v0 = vadd.f32 %v342_v56, %v310_v55  ;;  %v312_v1 = vmul.f32 11.313708, %v280_v61  ;;  %v281_v2 = vld [vmem:[%s1253_s12 + $0x88] sm:$0xff]  ;;  %v282_v4 = vld [vmem:[%s1253_s12 + $0x90] sm:$0xff]  ;;  %p841_p12 = pneg %p840_p9 }
  0xe8   : > { %v345_v3 = vld [vmem:[%s1180_s10 + $0x88] sm:$0xff]  ;;  %404 = vst [vmem:[%s1194_s13 + $0x60] sm:$0xff] %v372_v58  ;;  %v375_v5 = vadd.f32 %v343_v60, %v311_v59  ;;  %v313_v6 = vmul.f32 11.313708, %v281_v2  ;;  %v314_v7 = vmul.f32 11.313708, %v282_v4 }
  0xe9   : > { %v346_v8 = vld [vmem:[%s1180_s10 + $0x90] sm:$0xff]  ;;  %v283_v9 = vld [vmem:[%s1253_s12 + $0x98] sm:$0xff]  ;;  %405 = vst [vmem:[%s1194_s13 + $0x68] sm:$0xff] %v373_v63  ;;  %406 = vst [vmem:[%s1194_s13 + $0x70] sm:$0xff] %v374_v0  ;;  %v376_v10 = vadd.f32 %v344_v62, %v312_v1  ;;  %s842_s6 = sshll.u32 %s996_s18, 4  ;;  %s843_s6 = int_to_ptr.vmem [resolvable:$false] %s842_s6 }
  0xea   : > { %v315_v11 = vmul.f32 11.313708, %v283_v9  ;;  %v347_v12 = vld [vmem:[%s1180_s10 + $0x98] sm:$0xff]  ;;  %v284_v13 = vld [vmem:[%s1253_s12 + $0xa0] sm:$0xff]  ;;  %407 = vst [vmem:[%s1194_s13 + $0x78] sm:$0xff] %v375_v5  ;;  %v377_v15 = vadd.f32 %v345_v3, %v313_v6  ;;  %v378_v16 = vadd.f32 %v346_v8, %v314_v7  ;;  %v285_v18 = vld [vmem:[%s1253_s12 + $0xa8] sm:$0xff]  ;;  %p845_p1 = scmp.lt.s32.totalorder %s1350_s28, %s843_s6 }
  0xeb   : > { %v348_v14 = vld [vmem:[%s1180_s10 + $0xa0] sm:$0xff]  ;;  %v316_v17 = vmul.f32 11.313708, %v284_v13  ;;  %v349_v19 = vld [vmem:[%s1180_s10 + $0xa8] sm:$0xff]  ;;  %v286_v20 = vld [vmem:[%s1253_s12 + $0xb0] sm:$0xff]  ;;  %408 = vst [vmem:[%s1194_s13 + $0x80] sm:$0xff] %v376_v10 }
  0xec   : > { %v379_v21 = vadd.f32 %v347_v12, %v315_v11  ;;  %v317_v22 = vmul.f32 11.313708, %v285_v18  ;;  %v318_v23 = vmul.f32 11.313708, %v286_v20  ;;  %v350_v24 = vld [vmem:[%s1180_s10 + $0xb0] sm:$0xff]  ;;  %v287_v25 = vld [vmem:[%s1253_s12 + $0xb8] sm:$0xff] }
  0xed   : > { %409 = vst [vmem:[%s1194_s13 + $0x88] sm:$0xff] %v377_v15  ;;  %410 = vst [vmem:[%s1194_s13 + $0x90] sm:$0xff] %v378_v16  ;;  %v380_v26 = vadd.f32 %v348_v14, %v316_v17  ;;  %v319_v27 = vmul.f32 11.313708, %v287_v25  ;;  %v351_v28 = vld [vmem:[%s1180_s10 + $0xb8] sm:$0xff]  ;;  %v288_v29 = vld [vmem:[%s1253_s12 + $0xc0] sm:$0xff] }
  0xee   : > { %v352_v30 = vld [vmem:[%s1180_s10 + $0xc0] sm:$0xff]  ;;  %411 = vst [vmem:[%s1194_s13 + $0x98] sm:$0xff] %v379_v21  ;;  %v381_v31 = vadd.f32 %v349_v19, %v317_v22  ;;  %v382_v32 = vadd.f32 %v350_v24, %v318_v23  ;;  %v320_v33 = vmul.f32 11.313708, %v288_v29  ;;  %v289_v34 = vld [vmem:[%s1253_s12 + $0xc8] sm:$0xff]  ;;  %v290_v36 = vld [vmem:[%s1253_s12 + $0xd0] sm:$0xff] }
  0xef   : > { %v353_v35 = vld [vmem:[%s1180_s10 + $0xc8] sm:$0xff]  ;;  %412 = vst [vmem:[%s1194_s13 + $0xa0] sm:$0xff] %v380_v26  ;;  %v383_v37 = vadd.f32 %v351_v28, %v319_v27  ;;  %v321_v38 = vmul.f32 11.313708, %v289_v34  ;;  %v322_v39 = vmul.f32 11.313708, %v290_v36 }
  0xf0   : > { %v354_v40 = vld [vmem:[%s1180_s10 + $0xd0] sm:$0xff]  ;;  %v291_v41 = vld [vmem:[%s1253_s12 + $0xd8] sm:$0xff]  ;;  %413 = vst [vmem:[%s1194_s13 + $0xa8] sm:$0xff] %v381_v31  ;;  %414 = vst [vmem:[%s1194_s13 + $0xb0] sm:$0xff] %v382_v32  ;;  %v384_v42 = vadd.f32 %v352_v30, %v320_v33  ;;  %s844_s16 = scalar_lea.vmem %s843_s6, 8192 }
  0xf1   : > { %v323_v43 = vmul.f32 11.313708, %v291_v41  ;;  %v355_v44 = vld [vmem:[%s1180_s10 + $0xd8] sm:$0xff]  ;;  %v292_v45 = vld [vmem:[%s1253_s12 + $0xe0] sm:$0xff]  ;;  %415 = vst [vmem:[%s1194_s13 + $0xb8] sm:$0xff] %v383_v37  ;;  %v385_v47 = vadd.f32 %v353_v35, %v321_v38  ;;  %v386_v48 = vadd.f32 %v354_v40, %v322_v39  ;;  %v293_v50 = vld [vmem:[%s1253_s12 + $0xe8] sm:$0xff]  ;;  %p846_p3 = scmp.lt.s32.totalorder %s844_s16, %s838_s2 }
  0xf2   : > { %v356_v46 = vld [vmem:[%s1180_s10 + $0xe0] sm:$0xff]  ;;  %v324_v49 = vmul.f32 11.313708, %v292_v45  ;;  %v357_v51 = vld [vmem:[%s1180_s10 + $0xe8] sm:$0xff]  ;;  %v294_v52 = vld [vmem:[%s1253_s12 + $0xf0] sm:$0xff]  ;;  %416 = vst [vmem:[%s1194_s13 + $0xc0] sm:$0xff] %v384_v42 }
  0xf3   : > { %v387_v53 = vadd.f32 %v355_v44, %v323_v43  ;;  %v325_v54 = vmul.f32 11.313708, %v293_v50  ;;  %v326_v55 = vmul.f32 11.313708, %v294_v52  ;;  %v358_v56 = vld [vmem:[%s1180_s10 + $0xf0] sm:$0xff]  ;;  %v295_v57 = vld [vmem:[%s1253_s12 + $0xf8] sm:$0xff]  ;;  %p847_p4 = por %p846_p3, %p845_p1 }
  0xf4   : > { %417 = vst [vmem:[%s1194_s13 + $0xc8] sm:$0xff] %v385_v47  ;;  %418 = vst [vmem:[%s1194_s13 + $0xd0] sm:$0xff] %v386_v48  ;;  %v388_v58 = vadd.f32 %v356_v46, %v324_v49  ;;  %v327_v59 = vmul.f32 11.313708, %v295_v57  ;;  %v359_v60 = vld [vmem:[%s1180_s10 + $0xf8] sm:$0xff]  ;;  %s1363_s10 = scalar_lea.sflag [#allocation8], %s1453_s14 }
  0xf5   : > { %419 = vst [vmem:[%s1194_s13 + $0xd8] sm:$0xff] %v387_v53  ;;  %v389_v61 = vadd.f32 %v357_v51, %v325_v54  ;;  %v390_v62 = vadd.f32 %v358_v56, %v326_v55  ;;  %p848_p10 = pnand %p847_p4, %p841_p12 }
  0xf6   : > { %420 = vst [vmem:[%s1194_s13 + $0xe0] sm:$0xff] %v388_v58  ;;  %v391_v63 = vadd.f32 %v359_v60, %v327_v59 }
  0xf7   : > { %421 = vst [vmem:[%s1194_s13 + $0xe8] sm:$0xff] %v389_v61  ;;  %422 = vst [vmem:[%s1194_s13 + $0xf0] sm:$0xff] %v390_v62 }
  0xf8   : > { %423 = vst [vmem:[%s1194_s13 + $0xf8] sm:$0xff] %v391_v63 }
  0xf9   : > { %851 = shalt.err (!%p848_p10)
}
  0xfa   : > { %s852_s13 = scalar_lea.hbm %s1356_s5, 4096  ;;  %s856_s30 = scalar_lea.hbm %s1427_s3, 16384 }
  0xfb   : > { %p853_p7 = scmp.ne.s32.totalorder %s1356_s5, %s852_s13  ;;  %p857_p8 = scmp.lt.u32.totalorder %s1356_s5, %s1427_s3 }
  0xfc   : > { %p858_p11 = scmp.lt.u32.totalorder %s856_s30, %s852_s13  ;;  %p860_p13 = scmp.lt.u32.totalorder %s852_s13, %s1356_s5 }
  0xfd   : > { %p854_p2 = pnand %p853_p7, %p1454_p0 }
  0xfe   : > { %p859_p6 = por %p858_p11, %p857_p8 }
  0xff   : > { %p855_p5 = pneg %p854_p2 }
 0x100   : > { %p861_p9 = por %p860_p13, %p859_p6 }
 0x102   : > { %p862_p12 = pnand %p861_p9, %p855_p5 }
 0x104   : > { %865 = shalt.err (!%p862_p12)
}
 0x105   : > { %s997_s27 = smov 128   ;;  %s998_s19 = smov 8  }
 0x106   : > { %621 = dma.vmem_to_hbm [thread:$0]  (%p1454_p0), %s1350_s28, 4096, %s1356_s5, %s1363_s10, %s997_s27, %s997_s27, %s998_s19  }
 0x107 PF: > { %p632_p1 = scmp.ge.s32.totalorder %s976_s4, 2  ;;  %s455_s12 = sand.u32 1, %s936_s22  }
 0x108   : > { %p1455_p3 = scmp.ne.s32.totalorder %s1447_s25, 0  ;;  %s456_s9 = scalar_lea.sflag [#allocation8], %s455_s12 }
 0x10a   : > { %p628_p4 = pnand %p632_p1, %p1455_p3 }
 0x10c   : > { %931 = dma.done.wait (!%p628_p4), %s456_s9, 4096  }
 0x10d   : > { %933 = vsyncadd (!%p628_p4), %s456_s9, 4294963200  ;;  %s23_s4 = sadd.s32 1, %s976_s4   ;;  %s1456_s25 = sld [smem:[#allocation20_spill]] }
 0x10e   : > { %p20_p10 = scmp.ge.s32.totalorder %s23_s4, 6   ;;  %s1457_s26 = sld [smem:[#allocation21_spill]] }
 0x10f   : > { %s1458_s27 = sld [smem:[#allocation26_spill]]  ;;  %s1459_s0 = sld [smem:[#allocation22_spill]] }
 0x110   : > { %s1460_s28 = sld [smem:[#allocation23_spill]]  ;;  %s1461_s29 = sld [smem:[#allocation24_spill]] }
 0x111   : > { %s1462_s30 = sld [smem:[#allocation25_spill]]  ;;  %s1463_s22 = smov %s940_s23 }
 0x112   : > { %s1464_s23 = smov %s944_s24  ;;  %s1465_s24 = smov %s1117_s20 }
 0x113   :  { %22 = sbr.rel (!%p20_p10) target bundleno = 21 (0x15), region = 147 }
 0x11a   :  { %461 = vsyncpa [#allocation7], 1 }
 0x11b   :  { %463 = vsyncpa [#allocation7 + $0x1], 1 }
 0x11c   :  { %464 = vsyncpa [#allocation8], 1 }
 0x11d   :  { %466 = vsyncpa [#allocation8 + $0x1], 1 }
 0x11e   :  { %467 = vsyncmov [#allocation3] }
 0x121   :  { %s468_s20 = vpop.sfrf %467 }
 0x122   :  { %p609_p0 = scmp.ne.s32.totalorder %s468_s20, 0 }
 0x124   :  { %472 = shalt.err (%p609_p0)  }
 0x125   :  { %474 = vsyncmov [#allocation3 + $0x1] }
 0x128   :  { %s475_s21 = vpop.sfrf %474 }
 0x129   :  { %p610_p7 = scmp.ne.s32.totalorder %s475_s21, 0 }
 0x12b   :  { %479 = shalt.err (%p610_p7)  }

</bundles_post_ra>
